<compile_context>
chip_gen: v7x
topology: tpu7x:2x2x1
jax: 0.10.0
libtpu: 0.0.40
codegen_flags: <defaults>
</compile_context>

<pallas_src>
import functools
import math

import jax
import jax.numpy as jnp
from jax.experimental import pallas as pl
from jax.experimental.pallas import tpu as pltpu

_MULTIER = -math.log(10000.0)
_HALF_PI = 0.5 * math.pi


def _pe_kernel_nolens(const_ref, *refs, rows_per_seq, residual):
    """One (TR, W) tile of the batch-collapsed (B*R, W) slab (no length mask).

    const_ref : (2, W) f32 resident constants:
        row 0: k * freq(lane)                (angle increment per packed row)
        row 1: (lane_off + 1) * freq + phase (per-lane offset; folds 1-based
               position, within-row offset and the sin/cos phase)
    refs      : (x_ref, o_ref) if residual else (o_ref,)
    """
    if residual:
        x_ref, o_ref = refs
    else:
        (o_ref,) = refs

    tr, w = o_ref.shape
    row = jax.lax.broadcasted_iota(jnp.int32, (tr, w), 0) + pl.program_id(0) * tr
    # Packed-row index within the sequence (row % rows_per_seq).
    if (rows_per_seq & (rows_per_seq - 1)) == 0:           # power of two: cheap AND
        r = jnp.bitwise_and(row, rows_per_seq - 1)
    else:
        r = row - (row // rows_per_seq) * rows_per_seq

    ang = r.astype(jnp.float32) * const_ref[0:1, :] + const_ref[1:2, :]
    pe = jnp.sin(ang)                                      # cos(x) == sin(x + pi/2)
    if residual:
        pe = pe + x_ref[...].astype(jnp.float32)
    o_ref[...] = pe.astype(o_ref.dtype)


def _pe_kernel_lens(lens_ref, const_ref, *refs, pack_k, residual):
    """One (TR, W) tile of one batch element, masked by its valid length.

    lens_ref  : (B,) int32 in SMEM (scalar prefetch) — valid length per batch
    const_ref : (3, W) f32 resident constants: freq, phase, lane_pos (= lane//E + 1)
    refs      : (x_ref, o_ref) if residual else (o_ref,)
    """
    if residual:
        x_ref, o_ref = refs
    else:
        (o_ref,) = refs

    b = pl.program_id(0)
    t = pl.program_id(1)
    tr, w = o_ref.shape
    len_f = lens_ref[b].astype(jnp.float32)

    r = jax.lax.broadcasted_iota(jnp.int32, (tr, w), 0) + t * tr
    # 1-based sequence position of every element (exact in f32 for L <= 128).
    posp = r.astype(jnp.float32) * float(pack_k) + const_ref[2:3, :]
    pos = jnp.where(posp <= len_f, posp, 0.0)              # padded slots -> pe[0] row

    ang = pos * const_ref[0:1, :] + const_ref[1:2, :]
    pe = jnp.sin(ang)
    if residual:
        pe = pe + x_ref[...].astype(jnp.float32)
    o_ref[...] = pe.astype(o_ref.dtype)


def _choose_row_tile(num_rows, width, *, target_bytes=2 << 20, min_steps=4):
    """Row tile: multiple of 8, ~target_bytes of f32; full extent if small.

    Shrinks the tile (never below 8 rows) until the grid has >= min_steps
    steps so both v7x TensorCores / the DMA pipeline stay fed.
    """
    if num_rows <= 8:
        return num_rows
    rows_for_target = max(8, (target_bytes // (width * 4)) // 8 * 8)
    tr = min(num_rows // 8 * 8, rows_for_target)
    while tr > 8 and pl.cdiv(num_rows, tr) < min_steps:
        tr = max(8, (tr // 2) // 8 * 8)
    return tr


def positional_encoding(x, input_lens=None, *, residual=True, max_len=128):
    """Forward pass of PositionalEncoding (inference / eval mode)."""
    B, L, E = x.shape
    assert E % 2 == 0, "d_model must be even (same constraint as the torch module)"
    assert L <= max_len, "sequence longer than the module's positional table"

    # --- lane-dense packing of the trailing (L, E) dims --------------------
    W = (E * 128) // math.gcd(E, 128)      # lcm(E, 128)
    k = W // E                             # positions packed per row
    if L % k != 0:
        W, k = E, 1                        # fallback: masked partial stores
    R = (L * E) // W                       # packed rows per batch element

    # --- per-lane constants (built once; resident constant block) ----------
    ch = jnp.arange(E, dtype=jnp.int32)
    freq_e = jnp.exp(((ch // 2) * 2).astype(jnp.float32) * (_MULTIER / float(E)))
    phase_e = (ch % 2).astype(jnp.float32) * _HALF_PI
    freq = jnp.tile(freq_e, k)                                        # (W,)
    phase = jnp.tile(phase_e, k)                                      # (W,)
    lane_pos = (jnp.arange(W, dtype=jnp.int32) // E + 1).astype(jnp.float32)

    n_elem = B * L * E
    cost = pl.CostEstimate(
        flops=4 * n_elem,
        transcendentals=n_elem,
        bytes_accessed=(2 if residual else 1) * n_elem * jnp.dtype(x.dtype).itemsize,
    )

    if input_lens is None:
        # Fast path: no mask, batch collapsed into the row axis.
        const = jnp.stack([freq * float(k), lane_pos * freq + phase])  # (2, W)
        total_rows = B * R
        x_p = x.reshape(total_rows, W)                                 # free reshape
        TR = _choose_row_tile(total_rows, W)
        grid = (pl.cdiv(total_rows, TR),)

        kernel = functools.partial(_pe_kernel_nolens, rows_per_seq=R,
                                   residual=residual)
        const_spec = pl.BlockSpec((2, W), lambda t: (0, 0))
        tile_spec = pl.BlockSpec((TR, W), lambda t: (t, 0))

        in_specs = [const_spec]
        operands = [const]
        if residual:
            in_specs.append(tile_spec)
            operands.append(x_p)

        out = pl.pallas_call(
            kernel,
            out_shape=jax.ShapeDtypeStruct((total_rows, W), x.dtype),
            grid_spec=pltpu.PrefetchScalarGridSpec(
                num_scalar_prefetch=0,
                grid=grid,
                in_specs=in_specs,
                out_specs=tile_spec,
            ),
            compiler_params=pltpu.CompilerParams(
                dimension_semantics=("parallel",),
                vmem_limit_bytes=32 * 1024 * 1024,
            ),
            cost_estimate=cost,
        )(*operands)
    else:
        lens = input_lens.astype(jnp.int32)
        const = jnp.stack([freq, phase, lane_pos])                     # (3, W)
        x_p = x.reshape(B, R, W)
        TR = _choose_row_tile(R, W, min_steps=pl.cdiv(4, B))
        grid = (B, pl.cdiv(R, TR))

        kernel = functools.partial(_pe_kernel_lens, pack_k=k, residual=residual)
        const_spec = pl.BlockSpec((3, W), lambda b, t, lens: (0, 0))
        tile_spec = pl.BlockSpec((None, TR, W), lambda b, t, lens: (b, t, 0))

        in_specs = [const_spec]
        operands = [const]
        if residual:
            in_specs.append(tile_spec)
            operands.append(x_p)

        out = pl.pallas_call(
            kernel,
            out_shape=jax.ShapeDtypeStruct((B, R, W), x.dtype),
            grid_spec=pltpu.PrefetchScalarGridSpec(
                num_scalar_prefetch=1,
                grid=grid,
                in_specs=in_specs,
                out_specs=tile_spec,
            ),
            compiler_params=pltpu.CompilerParams(
                dimension_semantics=("parallel", "parallel"),
                vmem_limit_bytes=32 * 1024 * 1024,
            ),
            cost_estimate=cost,
        )(lens, *operands)

    # TODO(synk): nn.Dropout(p=0.1) is identity in eval mode; training-mode
    # dropout (scaled Bernoulli mask) is not implemented here.
    return out.reshape(B, L, E)


def _reference(x, input_lens=None, residual=True):
    """Pure-JAX reference replicating the torch module (eval mode)."""
    B, L, E = x.shape
    max_len = 129  # max_len=128 + 1 in __init__
    position = jnp.arange(0, max_len, dtype=jnp.float32)[:, None]
    div_term = jnp.exp(jnp.arange(0, E, 2, dtype=jnp.float32) * (_MULTIER / E))
    pe = jnp.zeros((max_len, E), jnp.float32)
    pe = pe.at[:, 0::2].set(jnp.sin(position * div_term))
    pe = pe.at[:, 1::2].set(jnp.cos(position * div_term))
    r = jnp.arange(1, L + 1, dtype=jnp.int32)[None, :]
    if input_lens is None:
        pos = jnp.broadcast_to(r, (B, L))
    else:
        pos = jnp.where(r <= input_lens[:, None].astype(jnp.int32), r, 0)
    gathered = pe[pos]                    # (B, L, E)
    return gathered + x if residual else gathered


if __name__ == "__main__":
    key = jax.random.PRNGKey(0)
    B, L, E = 2, 8, 32
    x = jax.random.normal(key, (B, L, E), dtype=jnp.float32)

    # Path 1: default (no input_lens), residual add — collapsed lane-dense path.
    out = jax.block_until_ready(positional_encoding(x))
    ref = _reference(x)
    assert out.shape == (B, L, E) and out.dtype == x.dtype
    assert jnp.allclose(out, ref, atol=1e-5, rtol=1e-5)

    # Path 2: input_lens (padded slots use padding row pe[0] = [0,1,0,1,...]).
    lens = jnp.array([5, 8], dtype=jnp.int32)
    out2 = jax.block_until_ready(positional_encoding(x, input_lens=lens))
    ref2 = _reference(x, input_lens=lens)
    assert jnp.allclose(out2, ref2, atol=1e-5, rtol=1e-5)

    # Path 3: residual=False (pe only; no x streamed through the kernel).
    out3 = jax.block_until_ready(
        positional_encoding(x, input_lens=lens, residual=False))
    ref3 = _reference(x, input_lens=lens, residual=False)
    assert jnp.allclose(out3, ref3, atol=1e-5, rtol=1e-5)

    # Path 4: maximum position (L == max_len) — bounds the sin(x+pi/2) drift.
    x4 = jax.random.normal(jax.random.PRNGKey(1), (2, 128, 32), dtype=jnp.float32)
    out4 = jax.block_until_ready(positional_encoding(x4))
    ref4 = _reference(x4)
    assert jnp.allclose(out4, ref4, atol=1e-4, rtol=1e-4)

    # Path 5: fallback W == E (L not divisible by the packing factor), non
    # power-of-two rows-per-sequence, and a partial tail row tile.
    x5 = jax.random.normal(jax.random.PRNGKey(2), (2, 10, 48), dtype=jnp.float32)
    out5 = jax.block_until_ready(positional_encoding(x5))
    ref5 = _reference(x5)
    assert jnp.allclose(out5, ref5, atol=1e-5, rtol=1e-5)

    print("KERNEL_OK")
</pallas_src>

<mosaic_0001>
module attributes {stable_mosaic.version = 11 : i64} {
  func.func @_pe_kernel_nolens(%arg0: i32, %arg1: memref<2x128xf32, #tpu.memory_space<vmem>>, %arg2: memref<4x128xf32, #tpu.memory_space<vmem>>, %arg3: memref<4x128xf32, #tpu.memory_space<vmem>>) attributes {dimension_semantics = [#tpu.dimension_semantics<parallel>], iteration_bounds = array<i64: 1>, scalar_prefetch = 0 : i64, scratch_operands = 0 : i64, tpu.core_type = #tpu.core_type<tc>, window_params = [{pipeline_mode = #tpu.pipeline_mode<synchronous>, transform_indices = @transform_0, window_bounds = array<i64: 2, 128>}, {transform_indices = @transform_1, window_bounds = array<i64: 4, 128>}, {transform_indices = @transform_2, window_bounds = array<i64: 4, 128>}]} {
    %0 = tpu.iota {dimensions = array<i32: 0>} : vector<4x128xi32>
    %c4_i32 = arith.constant 4 : i32
    %1 = arith.muli %arg0, %c4_i32 : i32
    %2 = vector.broadcast %1 : i32 to vector<4x128xi32>
    %3 = arith.addi %0, %2 : vector<4x128xi32>
    %c1_i32 = arith.constant 1 : i32
    %4 = vector.broadcast %c1_i32 : i32 to vector<4x128xi32>
    %5 = arith.andi %3, %4 : vector<4x128xi32>
    %6 = arith.sitofp %5 : vector<4x128xi32> to vector<4x128xf32>
    %c0 = arith.constant 0 : index
    %c0_0 = arith.constant 0 : index
    %7 = vector.load %arg1[%c0, %c0_0] : memref<2x128xf32, #tpu.memory_space<vmem>>, vector<1x128xf32>
    %8 = vector.broadcast %7 : vector<1x128xf32> to vector<4x128xf32>
    %9 = arith.mulf %6, %8 : vector<4x128xf32>
    %c1 = arith.constant 1 : index
    %c0_1 = arith.constant 0 : index
    %10 = vector.load %arg1[%c1, %c0_1] : memref<2x128xf32, #tpu.memory_space<vmem>>, vector<1x128xf32>
    %11 = vector.broadcast %10 : vector<1x128xf32> to vector<4x128xf32>
    %12 = arith.addf %9, %11 : vector<4x128xf32>
    %13 = math.sin %12 : vector<4x128xf32>
    %c0_2 = arith.constant 0 : index
    %c0_3 = arith.constant 0 : index
    %14 = vector.load %arg2[%c0_2, %c0_3] : memref<4x128xf32, #tpu.memory_space<vmem>>, vector<4x128xf32>
    %15 = arith.addf %13, %14 : vector<4x128xf32>
    %c0_4 = arith.constant 0 : index
    %c0_5 = arith.constant 0 : index
    %16 = vector.load %arg3[%c0_4, %c0_5] : memref<4x128xf32, #tpu.memory_space<vmem>>, vector<4x128xf32>
    tpu.vector_store %arg3[%c0_4, %c0_5], %15 {strides = array<i32>} : memref<4x128xf32, #tpu.memory_space<vmem>>, vector<4x128xf32>,
    return
  }
  func.func @transform_0(%arg0: i32) -> (i32, i32) {
    %c0_i32 = arith.constant 0 : i32
    %c0_i32_0 = arith.constant 0 : i32
    %c0_i32_1 = arith.constant 0 : i32
    return %c0_i32, %c0_i32_0 : i32, i32
  }
  func.func @transform_1(%arg0: i32) -> (i32, i32) {
    %c0_i32 = arith.constant 0 : i32
    %c0_i32_0 = arith.constant 0 : i32
    return %arg0, %c0_i32 : i32, i32
  }
  func.func @transform_2(%arg0: i32) -> (i32, i32) {
    %c0_i32 = arith.constant 0 : i32
    %c0_i32_0 = arith.constant 0 : i32
    return %arg0, %c0_i32 : i32, i32
  }
}

</mosaic_0001>

<bundles_post_ra>
// kernel: tpu_custom_call.1
= control target key start
LH: loop header
LB: loop body
LE: loop exit
PB: predicated region body
PF: predicated region fallthrough
CT: control target
= control target key end

     0   :  { %7 = vsyncpa [#allocation3], 0  ;;  %s354_s0 = inlined_call_operand.hbm [shape: f32[2,128], index: 0, kind: input, shape index: {}]   ;;  %s355_s1 = inlined_call_operand.hbm [shape: f32[4,128], index: 1, kind: input, shape index: {}]   ;;  %s356_s2 = inlined_call_operand.hbm [shape: f32[4,128], index: 2, kind: output, shape index: {}]  }
   0x1   :  { %8 = vsyncpa [#allocation6], 0 }
   0x2   :  { %9 = vsyncpa [#allocation4], 0  ;;  %s273_s9 = smov [#allocation2]   ;;  %s274_s11 = smov [#allocation5]  }
   0x3   :  { %s16_s10 = sshll.u32 %s273_s9, 4  ;;  %s26_s12 = sshll.u32 %s274_s11, 4  ;;  %s17_s10 = int_to_ptr.vmem [resolvable:$true] %s16_s10  ;;  %s27_s12 = int_to_ptr.vmem [resolvable:$true] %s26_s12 }
   0x4   :  { %s201_s15 = scalar_lea.hbm %s354_s0, 32 }
   0x5   :  { %p202_p0 = scmp.ne.s32.totalorder %s354_s0, %s201_s15  ;;  %p205_p1 = scmp.lt.u32.totalorder %s201_s15, %s354_s0 }
   0x7   :  { %p207_p2 = pnand %p205_p1, %p202_p0 }
   0x9   :  { %210 = shalt.err (!%p207_p2)
}
   0xa   :  { %s211_s20 = scalar_lea.vmem %s17_s10, 32  ;;  %p216_p4 = scmp.lt.s32.totalorder %s17_s10, %s17_s10 }
   0xb   :  { %p212_p3 = scmp.ne.s32.totalorder %s17_s10, %s211_s20  ;;  %p217_p5 = scmp.lt.s32.totalorder %s211_s20, %s211_s20 }
   0xd   :  { %p218_p6 = por %p217_p5, %p216_p4 }
   0xf   :  { %p219_p7 = pnand %p218_p6, %p212_p3 }
  0x11   :  { %222 = shalt.err (!%p219_p7)
}
  0x12   :  { %19 = dma.hbm_to_vmem [thread:$0]  %s354_s0, 32, %s17_s10, [#allocation3]  }
  0x13   :  { %s223_s25 = scalar_lea.hbm %s355_s1, 64 }
  0x14   :  { %p224_p8 = scmp.ne.s32.totalorder %s355_s1, %s223_s25  ;;  %p227_p9 = scmp.lt.u32.totalorder %s223_s25, %s355_s1 }
  0x16   :  { %p229_p10 = pnand %p227_p9, %p224_p8 }
  0x18   :  { %232 = shalt.err (!%p229_p10)
}
  0x19   :  { %s233_s30 = scalar_lea.vmem %s27_s12, 64  ;;  %p238_p12 = scmp.lt.s32.totalorder %s27_s12, %s27_s12 }
  0x1a   :  { %p234_p11 = scmp.ne.s32.totalorder %s27_s12, %s233_s30  ;;  %p239_p13 = scmp.lt.s32.totalorder %s233_s30, %s233_s30 }
  0x1c   :  { %p240_p0 = por %p239_p13, %p238_p12 }
  0x1e   :  { %p241_p1 = pnand %p240_p0, %p234_p11 }
  0x20   :  { %244 = shalt.err (!%p241_p1)
}
  0x21   :  { %29 = dma.hbm_to_vmem [thread:$0]  %s355_s1, 64, %s27_s12, [#allocation6]  }
  0x22   :  { %267 = dma.done.wait [#allocation3], 32  }
  0x23   :  { %268 = vsyncadd [#allocation3], 4294967264 }
  0x24   :  { %269 = dma.done.wait [#allocation6], 64  }
  0x25   :  { %270 = vsyncadd [#allocation6], 4294967232  ;;  %v36_v0 = vlaneseq  ;;  %v178_v4 = vld [vmem:[#allocation2] ss:$0 sm:$0xff]  ;;  %v179_v5 = vld [vmem:[#allocation2 + $0x1] ss:$0 sm:$0xff] }
  0x26   :  { %v275_v19 = vmov 683565275   ;;  %v276_v21 = vmov 2475754826   ;;  %v277_v23 = vmov 2131351028  }
  0x27   :  { %v37_v1 = vshrl.u32 %v36_v0, 7  ;;  %v278_v25 = vmov 2102212464   ;;  %v279_v27 = vmov 920167782   ;;  %s281_s1 = smov [#allocation7]  }
  0x28   :  { %v280_v34 = vmov 1326507024   ;;  %s168_s4 = sshll.u32 %s281_s1, 4  ;;  %s169_s4 = int_to_ptr.vmem [resolvable:$true] %s168_s4 }
  0x29   :  { %v41_v2 = vand.u32 1, %v37_v1  ;;  %s245_s5 = scalar_lea.vmem %s169_s4, 64  ;;  %p250_p3 = scmp.lt.s32.totalorder %s169_s4, %s169_s4 }
  0x2a   :  { %p246_p2 = scmp.ne.s32.totalorder %s169_s4, %s245_s5  ;;  %p251_p4 = scmp.lt.s32.totalorder %s245_s5, %s245_s5 }
  0x2b   :  { %v42_v3 = vcvt.s32.f32 %v41_v2 }
  0x2c   :  { %p252_p5 = por %p251_p4, %p250_p3 }
  0x2d   :  { %v48_v6 = vmul.f32 %v178_v4, %v42_v3 }
  0x2e   :  { %p253_p6 = pnand %p252_p5, %p246_p2 }
  0x2f   :  { %v321_v7 = vadd.f32 %v179_v5, %v48_v6 }
  0x31   :  { %v58_v8 = vand.u32 2139095040, %v321_v7  ;;  %v55_v10 = vand.u32 2147483647, %v321_v7  ;;  %vm57_vm7 = vcmp.lt.s32.totalorder %v321_v7, 0  ;;  %vm147_vm12 = vweird.f32 %v321_v7 }
  0x33   :  { %v59_v9 = vshrl.u32 %v58_v8, 23  ;;  %v62_v13 = vand.u32 8388607, %v55_v10  ;;  %vm56_vm8 = vcmp.le.f32.partialorder %v55_v10, 0.7853982 }
  0x35   :  { %v180_v11 = vadd.s32 4294967169, %v59_v9  ;;  %v63_v16 = vor.u32 8388608, %v62_v13 }
  0x37   :  { %v65_v12 = vadd.s32 1, %v180_v11  ;;  %v103_v36 = vshll.u32 %v63_v16, 8 }
  0x39   :  { %vm66_vm0 = vcmp.gt.s32.totalorder %v65_v12, 0 }
  0x3a   :  { %v67_v14 = vsel %vm66_vm0, %v65_v12, 0 }
  0x3b   :  { %v69_v15 = vand.u32 31, %v67_v14  ;;  %v68_v17 = vshrl.u32 %v67_v14, 5 }
  0x3d   :  { %v70_v18 = vsub.s32 32, %v69_v15  ;;  %v72_v20 = vshll.u32 %v275_v19, %v69_v15  ;;  %v75_v22 = vshll.u32 %v276_v21, %v69_v15  ;;  %v78_v24 = vshll.u32 %v277_v23, %v69_v15 }
  0x3e   :  { %v81_v26 = vshll.u32 %v278_v25, %v69_v15  ;;  %v84_v28 = vshll.u32 %v279_v27, %v69_v15  ;;  %vm87_vm1 = vcmp.lt.s32.totalorder %v68_v17, 1  ;;  %vm90_vm2 = vcmp.lt.s32.totalorder %v68_v17, 4 }
  0x3f   :  { %v71_v29 = vshrl.u32 %v275_v19, %v70_v18  ;;  %v73_v30 = vshrl.u32 %v276_v21, %v70_v18  ;;  %v76_v31 = vshrl.u32 %v277_v23, %v70_v18  ;;  %v79_v32 = vshrl.u32 %v278_v25, %v70_v18 }
  0x40   :  { %v82_v33 = vshrl.u32 %v279_v27, %v70_v18  ;;  %v85_v35 = vshrl.u32 %v280_v34, %v70_v18  ;;  %vm88_vm3 = vcmp.lt.s32.totalorder %v68_v17, 2  ;;  %vm89_vm4 = vcmp.lt.s32.totalorder %v68_v17, 3  ;;  %v159_v34 = vld [vmem:[#allocation5] sm:$0xf] }
  0x41   :  { %v74_v37 = vor.u32 %v73_v30, %v72_v20  ;;  %v77_v38 = vor.u32 %v76_v31, %v75_v22  ;;  %v80_v39 = vor.u32 %v79_v32, %v78_v24 }
  0x42   :  { %v83_v40 = vor.u32 %v82_v33, %v81_v26  ;;  %v86_v41 = vor.u32 %v85_v35, %v84_v28 }
  0x43   :  { %v91_v42 = vsel %vm87_vm1, %v71_v29, %v74_v37  ;;  %v92_v43 = vsel %vm90_vm2, %v80_v39, 2102212464  ;;  %v95_v44 = vsel %vm87_vm1, %v74_v37, %v77_v38  ;;  %v99_v45 = vsel %vm87_vm1, %v77_v38, %v80_v39 }
  0x44   :  { %v93_v46 = vsel %vm89_vm4, %v77_v38, %v92_v43  ;;  %v96_v47 = vsel %vm90_vm2, %v83_v40, 920167782  ;;  %v100_v48 = vsel %vm90_vm2, %v86_v41, 1326507024 }
  0x45   :  { %v97_v49 = vsel %vm89_vm4, %v80_v39, %v96_v47  ;;  %v101_v50 = vsel %vm89_vm4, %v83_v40, %v100_v48  ;;  %v94_v51 = vsel %vm88_vm3, %v91_v42, %v93_v46 }
  0x46   :  { %v98_v52 = vsel %vm88_vm3, %v95_v44, %v97_v49  ;;  %v102_v53 = vsel %vm88_vm3, %v99_v45, %v101_v50  ;;  %v110_v58 = vmul.u32 %v103_v36, %v94_v51 }
  0x47   :  { %v327_v54 = vmul.u32.u64.low %v103_v36, %v102_v53  ;;  %v328_v55 = vmul.u32.u64.high %v103_v36, %v102_v53, %v327_v54  ;;  %v330_v56 = vmul.u32.u64.low %v103_v36, %v98_v52  ;;  %v331_v57 = vmul.u32.u64.high %v103_v36, %v98_v52, %v330_v56 }
  0x49   :  { %vm112_vm5 = vc.u32 %v328_v55, %v330_v56  ;;  %v113_v59 = vadd.s32 1, %v331_v57  ;;  %v111_v6 = vadd.s32 %v330_v56, %v328_v55 }
  0x4b   :  { %v114_v60 = vsel %vm112_vm5, %v113_v59, %v331_v57 }
  0x4c   :  { %v115_v61 = vadd.s32 %v114_v60, %v110_v58 }
  0x4e   :  { %v116_v62 = vadd.s32 536870912, %v115_v61 }
  0x50   :  { %v117_v63 = vshrl.u32 %v116_v62, 30 }
  0x52   :  { %v118_v0 = vshll.u32 %v117_v63, 30  ;;  %v141_v20 = vsub.s32 4, %v117_v63 }
  0x54   :  { %v119_v1 = vsub.s32 %v115_v61, %v118_v0  ;;  %v142_v23 = vsel %vm57_vm7, %v141_v20, %v117_v63 }
  0x55   :  { %v144_v26 = vsel %vm56_vm8, 0, %v142_v23 }
  0x56   :  { %v121_v2 = vsub.s32 0, %v119_v1  ;;  %v148_v27 = vadd.s32 3, %v144_v26 }
  0x58   :  { %v181_v3 = vmin.u32 %v121_v2, %v119_v1  ;;  %v149_v28 = vand.u32 3, %v148_v27 }
  0x5a   :  { %v123_v4 = vclz %v181_v3  ;;  %vm154_vm9 = vcmp.eq.s32.totalorder %v149_v28, 2  ;;  %vm151_vm10 = vcmp.eq.s32.totalorder %v149_v28, 0  ;;  %vm150_vm11 = vcmp.lt.s32.totalorder %v149_v28, 2 }
  0x5c   :  { %v182_v5 = vadd.s32 4294967294, %v123_v4 }
  0x5e   :  { %vm183_vm6 = vcmp.lt.s32.totalorder %v182_v5, 0 }
  0x5f   :  { %v126_v8 = vsel %vm183_vm6, 0, %v182_v5 }
  0x60   :  { %v127_v9 = vsub.s32 32, %v126_v8  ;;  %v128_v11 = vshll.u32 %v119_v1, %v126_v8  ;;  %v131_v12 = vsub.s32 4294967266, %v126_v8 }
  0x62   :  { %v129_v13 = vshrl.u32 %v111_v6, %v127_v9  ;;  %v132_v14 = vadd.s32 127, %v131_v12 }
  0x64   :  { %v130_v15 = vor.u32 %v129_v13, %v128_v11  ;;  %v133_v16 = vshll.u32 %v132_v14, 23 }
  0x66   :  { %v134_v17 = vor.u32 4788187, %v133_v16  ;;  %v137_v18 = vcvt.s32.f32 %v130_v15 }
  0x68   :  { %v135_v19 = vand.u32 2147483647, %v134_v17 }
  0x6a   :  { %v138_v21 = vmul.f32 %v137_v18, %v135_v19 }
  0x6c   :  { %v139_v22 = vxor.u32 2147483648, %v138_v21 }
  0x6e   :  { %v140_v24 = vsel %vm57_vm7, %v139_v22, %v138_v21 }
  0x6f   :  { %v143_v25 = vsel %vm56_vm8, %v321_v7, %v140_v24 }
  0x70   :  { %197 = vcosq.f32 %v143_v25 }
  0x71   :  { %199 = vsinq.f32 %v143_v25 }
  0x7a   :  { %v198_v29 = vpop.eup %197 }
  0x7b   :  { %v200_v30 = vpop.eup %199  ;;  %v155_v31 = vxor.u32 2147483648, %v198_v29 }
  0x7c   :  { %v152_v32 = vxor.u32 2147483648, %v200_v30 }
  0x7d   :  { %v156_v10 = vsel %vm154_vm9, %v155_v31, %v200_v30 }
  0x7e   :  { %v153_v33 = vsel %vm151_vm10, %v198_v29, %v152_v32 }
  0x7f   :  { %v157_v35 = vsel %vm150_vm11, %v153_v33, %v156_v10 }
  0x80   :  { %v158_v36 = vsel %vm147_vm12, nan, %v157_v35 }
  0x81   :  { %v160_v37 = vadd.f32 %v159_v34, %v158_v36 }
  0x83   :  { %161 = vst [vmem:[#allocation7] sm:$0xf] %v160_v37 }
  0x84   :  { %256 = shalt.err (!%p253_p6)
}
  0x85   :  { %s257_s8 = scalar_lea.hbm %s356_s2, 64 }
  0x86   :  { %p258_p7 = scmp.ne.s32.totalorder %s356_s2, %s257_s8  ;;  %p261_p8 = scmp.lt.u32.totalorder %s257_s8, %s356_s2 }
  0x88   :  { %p263_p9 = pnand %p261_p8, %p258_p7 }
  0x8a   :  { %266 = shalt.err (!%p263_p9)
}
  0x8b   :  { %171 = dma.vmem_to_hbm [thread:$0]  %s169_s4, 64, %s356_s2, [#allocation4]  }
  0x8c   :  { %271 = dma.done.wait [#allocation4], 64  }
  0x8d   :  { %272 = vsyncadd [#allocation4], 4294967232 }
  0x8e   :  { %175 = vsyncpa [#allocation3], 1 }
  0x8f   :  { %176 = vsyncpa [#allocation6], 1 }
  0x90   :  { %177 = vsyncpa [#allocation4], 1 }

</bundles_post_ra>
